<compile_context>
chip_gen: v6e
topology: v6e:2x2x1
jax: 0.10.0
libtpu: 0.0.40
codegen_flags: <defaults>
</compile_context>

<pallas_src>
import math

import jax
import jax.numpy as jnp
from jax.experimental import pallas as pl
from jax.experimental.pallas import tpu as pltpu

KSIZE = 15
SIGMA = 9.0


def _gaussian_taps_1d(ksize, sigma):
    """1D Gaussian taps as Python floats; matches cv2.getGaussianKernel(ksize, sigma > 0)."""
    c = (ksize - 1) / 2.0
    vals = [math.exp(-((i - c) ** 2) / (2.0 * sigma * sigma)) for i in range(ksize)]
    s = sum(vals)
    return tuple(v / s for v in vals)


def _reflect_index(i, n):
    """Index map of F.pad(mode='reflect') (no edge repeat); valid while pad < n."""
    if i < 0:
        i = -i
    if i >= n:
        i = 2 * (n - 1) - i
    return i


def _blur_matrix(n, ksize, sigma):
    """(n, n) matrix B with (reflect_pad(x) conv taps)[o] = sum_k x[k] * B[k, o].

    Folds both the reflect padding and the 1-D Gaussian band into one constant
    dense matrix so the kernel never needs a padded input copy and each blur
    pass is a single MXU matmul.
    """
    taps = _gaussian_taps_1d(ksize, sigma)
    pad = (ksize - 1) // 2
    assert pad < n, "reflect padding requires pad < spatial size (same as F.pad)"
    mat = [[0.0] * n for _ in range(n)]
    for o in range(n):
        for t in range(ksize):
            src = _reflect_index(o + t - pad, n)
            mat[src][o] += taps[t]
    return jnp.asarray(mat, jnp.float32)


def _gauss_mxu_kernel(x_ref, cw_ref, ch_ref, o_ref):
    # x_ref : (1, 1, H, W)  one channel plane of one sample
    # cw_ref: (W, W)        horizontal reflect+blur matrix (applied on the right)
    # ch_ref: (H, H)        vertical   reflect+blur matrix (applied on the left)
    # o_ref : (1, 1, H, W)
    x = x_ref[0, 0].astype(jnp.float32)  # single cast; W stays on the lane axis
    h = jnp.dot(x, cw_ref[...], preferred_element_type=jnp.float32,
                precision=jax.lax.Precision.HIGHEST)
    y = jnp.dot(ch_ref[...], h, preferred_element_type=jnp.float32,
                precision=jax.lax.Precision.HIGHEST)
    o_ref[0, 0] = y.astype(o_ref.dtype)


def gaussian_smooth(x_nchw, *, ksize=KSIZE, sigma=SIGMA):
    """Forward pass of GaussionSmoothLayer(channel=C, kernel_size=ksize, sigma, dim=2)."""
    n, c, h, w = x_nchw.shape
    cw = _blur_matrix(w, ksize, sigma)       # (W, W): h = x @ cw
    ch = _blur_matrix(h, ksize, sigma).T     # (H, H): y = ch @ h

    itemsize = jnp.dtype(x_nchw.dtype).itemsize
    plane_bytes = h * w * itemsize
    flops = 2 * n * c * (h * w * w + h * h * w)
    bytes_accessed = 2 * n * c * plane_bytes + (h * h + w * w) * 4
    vmem_limit = int(min(64 << 20,
                         max(16 << 20,
                             4 * plane_bytes + 8 * (h * h + w * w) + (4 << 20))))

    # NOTE: for production W (>=128) the output last dim is lane-dense; the tiny
    # 16x16 self-test shape is pure per-step overhead either way.
    # TODO(synk): for multi-thousand-row images add an H-strip grid axis with a
    # (ksize-1)//2-row halo; per-channel-plane blocks already keep common image
    # sizes to a few MiB of VMEM per step.
    return pl.pallas_call(
        _gauss_mxu_kernel,
        out_shape=jax.ShapeDtypeStruct((n, c, h, w), x_nchw.dtype),
        grid=(n, c),
        in_specs=[
            pl.BlockSpec((1, 1, h, w), lambda i, j: (i, j, 0, 0)),
            pl.BlockSpec((w, w), lambda i, j: (0, 0)),
            pl.BlockSpec((h, h), lambda i, j: (0, 0)),
        ],
        out_specs=pl.BlockSpec((1, 1, h, w), lambda i, j: (i, j, 0, 0)),
        compiler_params=pltpu.CompilerParams(
            dimension_semantics=("parallel", "parallel"),
            vmem_limit_bytes=vmem_limit,
        ),
        cost_estimate=pl.CostEstimate(
            flops=flops, transcendentals=0, bytes_accessed=bytes_accessed),
    )(x_nchw, cw, ch)


def _reference(x_nchw, *, ksize=KSIZE, sigma=SIGMA):
    """Plain-JAX reference: direct (non-separable) depthwise 2D blur, f32."""
    taps = jnp.asarray(_gaussian_taps_1d(ksize, sigma), jnp.float32)
    k2d = jnp.outer(taps, taps)
    pad = (ksize - 1) // 2
    _, _, h, w = x_nchw.shape
    xp = jnp.pad(x_nchw, ((0, 0), (0, 0), (pad, pad), (pad, pad)), mode="reflect")
    acc = jnp.zeros_like(x_nchw)
    for ky in range(ksize):
        for kx in range(ksize):
            acc = acc + xp[:, :, ky:ky + h, kx:kx + w] * k2d[ky, kx]
    return acc


if __name__ == "__main__":
    key = jax.random.PRNGKey(0)
    # GaussionSmoothLayer(channel=3, kernel_size=15, sigma=9) on a 2x3x16x16 input.
    x = jax.random.normal(key, (2, 3, 16, 16), jnp.float32)

    fwd = jax.jit(gaussian_smooth)
    out = jax.block_until_ready(fwd(x))

    assert out.shape == x.shape, out.shape
    assert bool(jnp.all(jnp.isfinite(out)))

    ref = jax.block_until_ready(jax.jit(_reference)(x))
    err = float(jnp.max(jnp.abs(out - ref)))
    assert err < 1e-4, f"max abs error vs reference: {err}"

    print("KERNEL_OK")
</pallas_src>

<mosaic_0001>
module attributes {stable_mosaic.version = 11 : i64} {
  func.func @_gauss_mxu_kernel(%arg0: i32, %arg1: i32, %arg2: memref<1x1x16x16xf32, #tpu.memory_space<vmem>>, %arg3: memref<16x16xf32, #tpu.memory_space<vmem>>, %arg4: memref<16x16xf32, #tpu.memory_space<vmem>>, %arg5: memref<1x1x16x16xf32, #tpu.memory_space<vmem>>) attributes {dimension_semantics = [#tpu.dimension_semantics<parallel>, #tpu.dimension_semantics<parallel>], iteration_bounds = array<i64: 2, 3>, scalar_prefetch = 0 : i64, scratch_operands = 0 : i64, tpu.core_type = #tpu.core_type<tc>, window_params = [{transform_indices = @transform_0, window_bounds = array<i64: 1, 1, 16, 16>}, {pipeline_mode = #tpu.pipeline_mode<synchronous>, transform_indices = @transform_1, window_bounds = array<i64: 16, 16>}, {pipeline_mode = #tpu.pipeline_mode<synchronous>, transform_indices = @transform_2, window_bounds = array<i64: 16, 16>}, {transform_indices = @transform_3, window_bounds = array<i64: 1, 1, 16, 16>}]} {
    %c0 = arith.constant 0 : index
    %c0_0 = arith.constant 0 : index
    %c0_1 = arith.constant 0 : index
    %c0_2 = arith.constant 0 : index
    %0 = vector.load %arg2[%c0, %c0_0, %c0_1, %c0_2] : memref<1x1x16x16xf32, #tpu.memory_space<vmem>>, vector<1x1x16x16xf32>
    %1 = vector.shape_cast %0 : vector<1x1x16x16xf32> to vector<16x16xf32>
    %c0_3 = arith.constant 0 : index
    %c0_4 = arith.constant 0 : index
    %2 = vector.load %arg3[%c0_3, %c0_4] : memref<16x16xf32, #tpu.memory_space<vmem>>, vector<16x16xf32>
    %cst = arith.constant dense<0.000000e+00> : vector<16x16xf32>
    %3 = tpu.matmul %1, %2, %cst {dimension_numbers = #tpu.dot_dimension_numbers<[1], [0], [0], [1], [0, 0, 1, 1], [], []>, precision = #tpu.contract_precision<fp32>} : vector<16x16xf32>, vector<16x16xf32>, vector<16x16xf32> -> vector<16x16xf32>
    %c0_5 = arith.constant 0 : index
    %c0_6 = arith.constant 0 : index
    %4 = vector.load %arg4[%c0_5, %c0_6] : memref<16x16xf32, #tpu.memory_space<vmem>>, vector<16x16xf32>
    %cst_7 = arith.constant dense<0.000000e+00> : vector<16x16xf32>
    %5 = tpu.matmul %4, %3, %cst_7 {dimension_numbers = #tpu.dot_dimension_numbers<[1], [0], [0], [1], [0, 0, 1, 1], [], []>, precision = #tpu.contract_precision<fp32>} : vector<16x16xf32>, vector<16x16xf32>, vector<16x16xf32> -> vector<16x16xf32>
    %c0_8 = arith.constant 0 : index
    %c0_9 = arith.constant 0 : index
    %c0_10 = arith.constant 0 : index
    %c0_11 = arith.constant 0 : index
    %6 = vector.load %arg5[%c0_8, %c0_9, %c0_10, %c0_11] : memref<1x1x16x16xf32, #tpu.memory_space<vmem>>, vector<1x1x16x16xf32>
    %7 = vector.shape_cast %6 : vector<1x1x16x16xf32> to vector<16x16xf32>
    %8 = vector.shape_cast %5 : vector<16x16xf32> to vector<1x1x16x16xf32>
    tpu.vector_store %arg5[%c0_8, %c0_9, %c0_10, %c0_11], %8 {strides = array<i32>} : memref<1x1x16x16xf32, #tpu.memory_space<vmem>>, vector<1x1x16x16xf32>,
    return
  }
  func.func @transform_0(%arg0: i32, %arg1: i32) -> (i32, i32, i32, i32) {
    %c0_i32 = arith.constant 0 : i32
    %c0_i32_0 = arith.constant 0 : i32
    %c0_i32_1 = arith.constant 0 : i32
    return %arg0, %arg1, %c0_i32, %c0_i32_0 : i32, i32, i32, i32
  }
  func.func @transform_1(%arg0: i32, %arg1: i32) -> (i32, i32) {
    %c0_i32 = arith.constant 0 : i32
    %c0_i32_0 = arith.constant 0 : i32
    %c0_i32_1 = arith.constant 0 : i32
    return %c0_i32, %c0_i32_0 : i32, i32
  }
  func.func @transform_2(%arg0: i32, %arg1: i32) -> (i32, i32) {
    %c0_i32 = arith.constant 0 : i32
    %c0_i32_0 = arith.constant 0 : i32
    %c0_i32_1 = arith.constant 0 : i32
    return %c0_i32, %c0_i32_0 : i32, i32
  }
  func.func @transform_3(%arg0: i32, %arg1: i32) -> (i32, i32, i32, i32) {
    %c0_i32 = arith.constant 0 : i32
    %c0_i32_0 = arith.constant 0 : i32
    %c0_i32_1 = arith.constant 0 : i32
    return %arg0, %arg1, %c0_i32, %c0_i32_0 : i32, i32, i32, i32
  }
}

</mosaic_0001>

<bundles_post_ra>
// kernel: gaussian_smooth.1
= control target key start
LH: loop header
LB: loop body
LE: loop exit
PB: predicated region body
PF: predicated region fallthrough
CT: control target
= control target key end

     0   :  { %s2106_s0 = inlined_call_operand.hbm [shape: f32[2,3,16,16], index: 0, kind: input, shape index: {}]   ;;  %s2107_s1 = inlined_call_operand.hbm [shape: f32[16,16], index: 1, kind: input, shape index: {}]   ;;  %s2108_s2 = inlined_call_operand.hbm [shape: f32[16,16], index: 2, kind: input, shape index: {}]   ;;  %s2109_s3 = inlined_call_operand.hbm [shape: f32[2,3,16,16], index: 3, kind: output, shape index: {}]  }
   0x1   :  { %2115 = sst [smem:[#allocation15_spill]] %s2107_s1 }
   0x2   :  { %2116 = sst [smem:[#allocation16_spill]] %s2108_s2 }
   0x3   :  { %8 = vsyncpa [#allocation3], 0 }
   0x4   :  { %10 = vsyncpa [#allocation3 + $0x1], 0 }
   0x5   :  { %11 = vsyncpa [#allocation6], 0 }
   0x6   :  { %12 = vsyncpa [#allocation4], 0 }
   0x7   :  { %14 = vsyncpa [#allocation4 + $0x1], 0  ;;  %s1852_s12 = smov 0   ;;  %s1854_s13 = smov 0  }
   0x8   :  { %s1856_s14 = smov 0   ;;  %s1858_s15 = smov 0  }
   0x9   :  { %s1860_s16 = smov 0   ;;  %s1862_s17 = smov 0  }
   0xa   :  { %s1864_s18 = smov 0   ;;  %s1866_s19 = smov 0  }
   0xb LB: > { %2117 = sst [smem:[#allocation12_spill]] %s1794_s12  ;;  %s1386_s20 = sadd.s32 4294967295, %s1822_s19   ;;  %s1822_s19 = sphi %s1866_s19, %s20_s19   ;;  %s1818_s18 = sphi %s1864_s18, %s2142_s18   ;;  %s1814_s17 = sphi %s1862_s17, %s2141_s17   ;;  %s1810_s16 = sphi %s1860_s16, %s2140_s16   ;;  %s1806_s15 = sphi %s1858_s15, %s2139_s15   ;;  %s1802_s14 = sphi %s1856_s14, %s2138_s14   ;;  %s1798_s13 = sphi %s1854_s13, %s2137_s13   ;;  %s1794_s12 = sphi %s1852_s12, %s2136_s12  }
   0xc   : > { %s1387_s21 = sadd.s32 4294967294, %s1822_s19   ;;  %p54_p0 = scmp.ne.s32.totalorder %s1798_s13, %s1794_s12 }
   0xd   : > { %p1896_p1 = scmp.eq.s32.totalorder %s1386_s20, 0  ;;  %p1900_p2 = scmp.eq.s32.totalorder %s1386_s20, 5 }
   0xe   : > { %p128_p3 = scmp.eq.s32.totalorder %s1387_s21, 5  ;;  %p1388_p5 = scmp.ge.s32.totalorder %s1822_s19, 1 }
   0xf   : > { %p1906_p4 = por %p1896_p1, %p54_p0  ;;  %p135_p7 = scmp.lt.s32.totalorder %s1822_s19, 7 }
  0x10   : > { %p1911_p6 = por %p128_p3, %p54_p0  ;;  %s1824_s27 = smov [#allocation5]  }
  0x11   : > { %p1916_p8 = pnand %p1388_p5, %p135_p7  ;;  %s147_s28 = sshll.u32 %s1824_s27, 4  ;;  %s148_s28 = int_to_ptr.vmem [resolvable:$true] %s147_s28 }
  0x12   : > { %s2121_s25 = scalar_select %p1911_p6, 1, 0 }
  0x13   : > { %p1551_p9 = pneg %p1916_p8  ;;  %s1825_s30 = smov [#allocation7]  }
  0x14   : > { %2122 = sst [smem:[#allocation13_spill]] %s2121_s25  ;;  %s160_s4 = sshll.u32 %s1825_s30, 4  ;;  %s161_s4 = int_to_ptr.vmem [resolvable:$true] %s160_s4 }
  0x15   : > { %p1924_p10 = pnand %p1551_p9, %p1896_p1  ;;  %s1653_s5 = scalar_lea.vmem %s148_s28, 256 }
  0x16   : > { %p1654_p12 = scmp.ne.s32.totalorder %s148_s28, %s1653_s5  ;;  %p1661_p3 = scmp.lt.s32.totalorder %s148_s28, %s148_s28 }
  0x17   : > { %p1644_p11 = pneg %p1924_p10  ;;  %p1662_p5 = scmp.lt.s32.totalorder %s1653_s5, %s1653_s5 }
  0x19   : > { %p1656_p13 = pnand %p1654_p12, %p1644_p11  ;;  %p1663_p7 = por %p1662_p5, %p1661_p3 }
  0x1b   : > { %p1657_p0 = pneg %p1656_p13 }
  0x1d   : > { %p1664_p9 = pnand %p1663_p7, %p1657_p0 }
  0x1f   : > { %1667 = shalt.err (!%p1664_p9)
}
  0x20   : > { %s2110_s6 = smov 128   ;;  %s2111_s7 = smov 8  }
  0x21   : > { %s2125_s1 = sld [smem:[#allocation15_spill]]  ;;  %s1679_s10 = scalar_lea.vmem %s161_s4, 256 }
  0x22   : > { %p1680_p12 = scmp.ne.s32.totalorder %s161_s4, %s1679_s10  ;;  %p1687_p0 = scmp.lt.s32.totalorder %s161_s4, %s161_s4 }
  0x23   : > { %p1688_p5 = scmp.lt.s32.totalorder %s1679_s10, %s1679_s10 }
  0x24   : > { %p1682_p13 = pnand %p1680_p12, %p1644_p11 }
  0x25   : > { %p1689_p7 = por %p1688_p5, %p1687_p0 }
  0x26   : > { %p1683_p3 = pneg %p1682_p13 }
  0x27   : > { %1554 = dma.hbm_to_vmem [thread:$0]  (!%p1924_p10), %s2125_s1, 256, %s148_s28, [#allocation6], %s2110_s6, %s2110_s6, %s2111_s7  }
  0x28   : > { %p1690_p9 = pnand %p1689_p7, %p1683_p3 }
  0x2a   : > { %1693 = shalt.err (!%p1690_p9)
}
  0x2b   : > { %s2126_s2 = sld [smem:[#allocation16_spill]]  ;;  %s29_s21 = sadd.s32 1, %s1814_s17 }
  0x2c   : > { %s32_s27 = sadd.s32 1, %s1818_s18  ;;  %p30_p11 = scmp.ge.s32.totalorder %s29_s21, 3 }
  0x2d   : > { %s41_s28 = sadd.s32 1, %s1802_s14  ;;  %p48_p12 = scmp.ne.s32.totalorder %s1802_s14, %s1798_s13 }
  0x2e   : > { %p49_p13 = scmp.eq.s32.totalorder %s1822_s19, 0  ;;  %s2144_s21 = smov (%p30_p11, %s29_s21), 0 }
  0x2f   : > { %2127 = sst [smem:[#allocation14_spill]] %s2144_s21  ;;  %s2146_s27 = smov (!%p30_p11, %s32_s27), %s1818_s18 }
  0x30   : > { %s37_s29 = ssub.s32 %s1814_s17, %s2144_s21  ;;  %p1963_p3 = por %p49_p13, %p48_p12 }
  0x31   : > { %1557 = dma.hbm_to_vmem [thread:$0]  (!%p1924_p10), %s2126_s2, 256, %s161_s4, [#allocation6], %s2110_s6, %s2110_s6, %s2111_s7  }
  0x32   : > { %p34_p10 = scmp.ge.s32.totalorder %s2146_s27, 2  ;;  %p1969_p0 = por %p1900_p2, %p48_p12 }
  0x33   : > { %p1568_p5 = scmp.lt.s32.totalorder %s1822_s19, 6  ;;  %s174_s5 = sand.u32 1, %s1802_s14  }
  0x34   : > { %s2148_s27 = smov (%p34_p10, %s2146_s27), 0  ;;  %s1392_s8 = sshll.u32 %s174_s5, 4 }
  0x35   : > { %s36_s9 = ssub.s32 %s1818_s18, %s2148_s27  ;;  %s1393_s11 = sshll.u32 %s1814_s17, 1 }
  0x36   : > { %s38_s10 = sor.u32 %s37_s29, %s36_s9  ;;  %s1537_s20 = smul.u32 6, %s1818_s18 }
  0x37   : > { %p39_p7 = scmp.eq.s32.totalorder %s38_s10, 0  ;;  %s178_s6 = scalar_lea.vmem [#allocation2], %s1392_s8 }
  0x38   : > { %s187_s7 = sshll.u32 %s178_s6, 4  ;;  %p1983_p9 = pnand %p1568_p5, %p1963_p3  ;;  %s188_s7 = int_to_ptr.vmem [resolvable:$true] %s187_s7 }
  0x39   : > { %s1988_s1 = scalar_select %p39_p7, %s1802_s14, %s41_s28  }
  0x3a   : > { %s184_s2 = sadd.s32 %s1537_s20, %s1393_s11  ;;  %s175_s9 = scalar_lea.sflag [#allocation3], %s174_s5 }
  0x3b   : > { %s1394_s21 = sshll.u32 %s184_s2, 7  ;;  %p1696_p2 = pneg %p1983_p9 }
  0x3c   : > { %s186_s29 = scalar_lea.hbm %s2106_s0, %s1394_s21  ;;  %s1707_s8 = scalar_lea.vmem %s188_s7, 256 }
  0x3d   : > { %p1708_p11 = scmp.ne.s32.totalorder %s188_s7, %s1707_s8  ;;  %s1828_s6 = smov [#allocation2]  }
  0x3e   : > { %s1712_s30 = sshll.u32 %s1828_s6, 4  ;;  %s1713_s30 = int_to_ptr.vmem [resolvable:$false] %s1712_s30 }
  0x3f   : > { %p1710_p12 = pnand %p1708_p11, %p1696_p2  ;;  %s1714_s10 = scalar_lea.vmem %s1713_s30, 512 }
  0x40   : > { %p1715_p3 = scmp.lt.s32.totalorder %s188_s7, %s1713_s30  ;;  %p1716_p10 = scmp.lt.s32.totalorder %s1714_s10, %s1707_s8 }
  0x41   : > { %p1711_p13 = pneg %p1710_p12 }
  0x42   : > { %p1717_p5 = por %p1716_p10, %p1715_p3 }
  0x44   : > { %p1718_p7 = pnand %p1717_p5, %p1711_p13 }
  0x46   : > { %1721 = shalt.err (!%p1718_p7)
}
  0x47   : > { %s2131_s2 = smov 8   ;;  %s2132_s12 = smov 128  }
  0x48   : > { %1561 = dma.hbm_to_vmem [thread:$0]  (!%p1983_p9), %s186_s29, 256, %s188_s7, %s175_s9, %s2132_s12, %s2132_s12, %s2131_s2  }
  0x49   : > { %199 = sbr.rel (%p1916_p8) target bundleno = 537 (0x219), region = 32  ;;  %s2003_s25 = sand.u32 (!%p1916_p8), 1, %s1798_s13  }
  0x4a   : > { %s1396_s21 = sshll.u32 (!%p1916_p8), %s2003_s25, 4  ;;  %s202_s28 = scalar_lea.sflag (!%p1916_p8), [#allocation3], %s2003_s25 }
  0x4b   : > { %s205_s5 = scalar_lea.vmem (!%p1916_p8), [#allocation2], %s1396_s21 }
  0x4e   : > { %1781 = dma.done.wait (%p1906_p4), %s202_s28, 256  }
  0x4f   : > { %1783 = vsyncadd (%p1906_p4), %s202_s28, 4294967040 }
  0x50   : > { %1785 = dma.done.wait (%p1896_p1), [#allocation6], 512  }
  0x51   : > { %1787 = vsyncadd (%p1896_p1), [#allocation6], 4294966784  ;;  %vm240_vm0 = vcmask 130048   ;;  %v239_v0 = vld [vmem:[#allocation5 + $0x8] sm:$0xff]  ;;  %v238_v1 = vld [vmem:[#allocation5] sm:$0xff]  ;;  %s1538_s22 = smul.u32 6, %s1810_s16 }
  0x52   : > { %v236_v2 = vld [vmem:[%s205_s5] sm:$0xff]  ;;  %v276_v3 = vand.u32 4294901760, %v239_v0  ;;  %v279_v4 = vand.u32 4294901760, %v238_v1  ;;  %v237_v6 = vld [vmem:[%s205_s5 + $0x8] sm:$0xff]  ;;  %s1401_s24 = sshll.u32 %s1806_s15, 1  ;;  %s235_s7 = scalar_lea.vmem [#allocation8], %s1396_s21 }
  0x53   : > { %v242_v5 = vsel %vm240_vm0, %v236_v2, 0  ;;  %v245_v8 = vsel %vm240_vm0, %v237_v6, 0  ;;  %v749_v26 = vld [vmem:[#allocation7] sm:$0xff]  ;;  %v750_v33 = vld [vmem:[#allocation7 + $0x8] sm:$0xff]  ;;  %s1274_s26 = sadd.s32 %s1538_s22, %s1401_s24  ;;  %s1277_s11 = sshll.u32 %s235_s7, 4  ;;  %s2046_s11 = int_to_ptr.vmem [resolvable:$true] %s1277_s11 }
  0x54   : > { %v314_v7 = vand.u32 4294901760, %v242_v5  ;;  %1453 = vmatprep.subr.mxu0 %v276_v3  ;;  %v364_v9 = vsub.f32 %v239_v0, %v276_v3  ;;  %v324_v10 = vand.u32 4294901760, %v245_v8  ;;  %v371_v11 = vsub.f32 %v238_v1, %v279_v4  ;;  %s1402_s20 = sshll.u32 %s1274_s26, 7  ;;  %s1262_s29 = scalar_lea.sflag [#allocation4], %s2003_s25 }
  0x55   : > { %1454 = vmatpush3.msra.mxu0 %v276_v3  ;;  %v752_v27 = vsel %vm240_vm0, %v749_v26, 0  ;;  %v755_v34 = vsel %vm240_vm0, %v750_v33, 0  ;;  %s2051_s23 = scalar_lea.hbm %s2109_s3, %s1402_s20  ;;  %s1722_s9 = scalar_lea.vmem %s2046_s11, 256 }
  0x56   : > { %v315_v12 = vsub.f32 %v242_v5, %v314_v7  ;;  %1464 = vmatprep.mubr.f32.mxu1 %v314_v7  ;;  %1455 = vmatprep.subr.mxu0 %v279_v4  ;;  %v365_v13 = vand.u32 4294901760, %v364_v9  ;;  %v325_v14 = vsub.f32 %v245_v8, %v324_v10  ;;  %v372_v15 = vand.u32 4294901760, %v371_v11  ;;  %p1723_p1 = scmp.ne.s32.totalorder %s2046_s11, %s1722_s9  ;;  %s1829_s8 = smov [#allocation8]  }
  0x57   : > { %1456 = vmatpush3.msra.mxu0 %v279_v4  ;;  %v2020_v28 = vand.u32 4294901760, %v752_v27  ;;  %v2031_v38 = vand.u32 4294901760, %v755_v34  ;;  %s1726_s6 = sshll.u32 %s1829_s8, 4  ;;  %s1727_s6 = int_to_ptr.vmem [resolvable:$false] %s1726_s6 }
  0x58   : > { %v316_v16 = vand.u32 4294901760, %v315_v12  ;;  %v366_v17 = vsub.f32 %v364_v9, %v365_v13  ;;  %v326_v18 = vand.u32 4294901760, %v325_v14  ;;  %v373_v19 = vsub.f32 %v371_v11, %v372_v15  ;;  %1467 = vmatprep.subr.mxu0 %v364_v9  ;;  %p1724_p4 = pnand %p1723_p1, %p1969_p0  ;;  %s1728_s30 = scalar_lea.vmem %s1727_s6, 512 }
  0x59   : > { %v2023_v29 = vsub.f32 %v752_v27, %v2020_v28  ;;  %v835_v44 = vsub.f32 %v755_v34, %v2031_v38  ;;  %p1729_p9 = scmp.lt.s32.totalorder %s2046_s11, %s1727_s6  ;;  %p1730_p2 = scmp.lt.s32.totalorder %s1728_s30, %s1722_s9 }
  0x5a   : > { %v317_v20 = vsub.f32 %v315_v12, %v316_v16  ;;  %v367_v21 = vand.u32 4294901760, %v366_v17  ;;  %v327_v22 = vsub.f32 %v325_v14, %v326_v18  ;;  %v374_v23 = vand.u32 4294901760, %v373_v19  ;;  %p1725_p8 = pneg %p1724_p4 }
  0x5b   : > { %v826_v30 = vand.u32 4294901760, %v2023_v29  ;;  %v836_v50 = vand.u32 4294901760, %v835_v44  ;;  %p1731_p11 = por %p1730_p2, %p1729_p9 }
  0x5c   : > { %v318_v24 = vand.u32 4294901760, %v317_v20  ;;  %1460 = vmatprep.subr.mxu1 %v367_v21  ;;  %v328_v25 = vand.u32 4294901760, %v327_v22 }
  0x5d   : > { %1461 = vmatpush3.msra.mxu1 %v367_v21  ;;  %v827_v31 = vsub.f32 %v2023_v29, %v826_v30  ;;  %v837_v58 = vsub.f32 %v835_v44, %v836_v50  ;;  %p1732_p12 = pnand %p1731_p11, %p1725_p8 }
  0x5e   : > { %1457 = vmatprep.mubr.f32.mxu0 %v318_v24  ;;  %1462 = vmatprep.subr.mxu1 %v374_v23 }
  0x5f   : > { %1458 = vmatmul.mubr.f32.vlgmr.msra.gmra.mxu0 %v328_v25  ;;  %1463 = vmatpush3.msra.mxu1 %v374_v23  ;;  %v828_v32 = vand.u32 4294901760, %v827_v31  ;;  %v838_v0 = vand.u32 4294901760, %v837_v58 }
  0x60   : > { %1468 = vmatpush3.msra.mxu0 %v364_v9  ;;  %1465 = vmatmul.mubr.f32.vlgmr.msra.gmra.mxu1 %v324_v10 }
  0x61   : > { %1469 = vmatprep.subr.mxu0 %v371_v11  ;;  %1474 = vmatprep.subr.mxu1 %v276_v3 }
  0x62   : > { %1470 = vmatpush3.msra.mxu0 %v371_v11  ;;  %1471 = vmatprep.mubr.f32.mxu0 %v315_v12 }
  0x63   : > { %1475 = vmatpush3.msra.mxu1 %v276_v3  ;;  %1472 = vmatmul.mubr.f32.vlgmr.msra.gmra.mxu0 %v325_v14 }
  0x64   : > { %1476 = vmatprep.subr.mxu1 %v279_v4  ;;  %1481 = vmatprep.subr.mxu0 %v365_v13 }
  0x65   : > { %1477 = vmatpush3.msra.mxu1 %v279_v4  ;;  %1478 = vmatprep.mubr.f32.mxu1 %v316_v16 }
  0x66   : > { %1482 = vmatpush3.msra.mxu0 %v365_v13  ;;  %1479 = vmatmul.mubr.f32.vlgmr.msra.gmra.mxu1 %v326_v18 }
  0x67   : > { %1483 = vmatprep.subr.mxu0 %v372_v15  ;;  %1488 = vmatprep.subr.mxu1 %v276_v3 }
  0x68   : > { %1484 = vmatpush3.msra.mxu0 %v372_v15  ;;  %1485 = vmatprep.mubr.f32.mxu0 %v314_v7 }
  0x69   : > { %1489 = vmatpush3.msra.mxu1 %v276_v3  ;;  %1486 = vmatmul.mubr.f32.vlgmr.msra.gmra.mxu0 %v324_v10 }
  0x6a   : > { %1490 = vmatprep.subr.mxu1 %v279_v4  ;;  %1492 = vmatprep.mubr.f32.mxu1 %v314_v7 }
  0x6b   : > { %1491 = vmatpush3.msra.mxu1 %v279_v4  ;;  %1499 = vmatprep.mubr.f32.mxu0 %v828_v32 }
  0x6c   : > { %1493 = vmatmul.mubr.f32.vlgmr.msra.gmra.mxu1 %v324_v10 }
  0x6d   : > { %1506 = vmatprep.mubr.f32.mxu1 %v2020_v28 }
 0x11f   : > { %v1459_v35 = vpop.f32.mrf.mxu0 }
 0x120   : > { %v1466_v37 = vpop.f32.mrf.mxu1 }
 0x121   : > { %v320_v36 = vpop.f32.mrf.mxu0  ;;  %v418_v39 = vadd.f32 %v1466_v37, %v1459_v35 }
 0x122   : > { %v411_v40 = vpop.f32.mrf.mxu1 }
 0x123   : > { %v412_v41 = vadd.f32 %v411_v40, %v320_v36  ;;  %v1473_v42 = vpop.f32.mrf.mxu0 }
 0x124   : > { %v501_v43 = vadd.f32 %v1473_v42, %v418_v39 }
 0x125   : > { %v493_v45 = vpop.f32.mrf.mxu0 }
 0x126   : > { %v494_v46 = vadd.f32 %v493_v45, %v412_v41  ;;  %v1480_v47 = vpop.f32.mrf.mxu1 }
 0x127   : > { %v584_v48 = vadd.f32 %v1480_v47, %v501_v43 }
 0x128   : > { %v575_v49 = vpop.f32.mrf.mxu1 }
 0x129   : > { %v576_v51 = vadd.f32 %v575_v49, %v494_v46  ;;  %v1487_v52 = vpop.f32.mrf.mxu0 }
 0x12a   : > { %v667_v53 = vadd.f32 %v1487_v52, %v584_v48 }
 0x12b   : > { %v660_v54 = vpop.f32.mrf.mxu0 }
 0x12c   : > { %v1494_v55 = vpop.f32.mrf.mxu1  ;;  %v661_v56 = vadd.f32 %v660_v54, %v576_v51 }
 0x12d   : > { %v746_v57 = vadd.f32 %v1494_v55, %v667_v53 }
 0x12e   : > { %v739_v59 = vpop.f32.mrf.mxu1 }
 0x12f   : > { %v786_v60 = vand.u32 4294901760, %v746_v57  ;;  %v740_v61 = vadd.f32 %v739_v59, %v661_v56 }
 0x131   : > { %v874_v62 = vsub.f32 %v746_v57, %v786_v60  ;;  %v789_v63 = vand.u32 4294901760, %v740_v61  ;;  %1495 = vmatprep.subr.mxu0 %v786_v60 }
 0x132   : > { %1496 = vmatpush3.msra.mxu0 %v786_v60 }
 0x133   : > { %v881_v1 = vsub.f32 %v740_v61, %v789_v63  ;;  %1497 = vmatprep.subr.mxu0 %v789_v63  ;;  %v875_v2 = vand.u32 4294901760, %v874_v62 }
 0x134   : > { %1498 = vmatpush3.msra.mxu0 %v789_v63 }
 0x135   : > { %1509 = vmatprep.subr.mxu0 %v874_v62  ;;  %1500 = vmatmul.mubr.f32.vlgmr.msra.gmra.mxu0 %v838_v0  ;;  %v876_v3 = vsub.f32 %v874_v62, %v875_v2  ;;  %v882_v4 = vand.u32 4294901760, %v881_v1 }
 0x136   : > { %1510 = vmatpush3.msra.mxu0 %v874_v62  ;;  %1513 = vmatprep.mubr.f32.mxu0 %v2023_v29 }
 0x137   : > { %1511 = vmatprep.subr.mxu0 %v881_v1  ;;  %v877_v5 = vand.u32 4294901760, %v876_v3  ;;  %v883_v6 = vsub.f32 %v881_v1, %v882_v4 }
 0x138   : > { %1512 = vmatpush3.msra.mxu0 %v881_v1 }
 0x139   : > { %1502 = vmatprep.subr.mxu1 %v877_v5  ;;  %1523 = vmatprep.subr.mxu0 %v875_v2  ;;  %v884_v7 = vand.u32 4294901760, %v883_v6 }
 0x13a   : > { %1503 = vmatpush3.msra.mxu1 %v877_v5  ;;  %1514 = vmatmul.mubr.f32.vlgmr.msra.gmra.mxu0 %v835_v44 }
 0x13b   : > { %1524 = vmatpush3.msra.mxu0 %v875_v2  ;;  %1504 = vmatprep.subr.mxu1 %v884_v7 }
 0x13c   : > { %1525 = vmatprep.subr.mxu0 %v882_v4  ;;  %1505 = vmatpush3.msra.mxu1 %v884_v7 }
 0x13d   : > { %1526 = vmatpush3.msra.mxu0 %v882_v4  ;;  %1507 = vmatmul.mubr.f32.vlgmr.msra.gmra.mxu1 %v2031_v38 }
 0x13e   : > { %1516 = vmatprep.subr.mxu1 %v786_v60  ;;  %1520 = vmatprep.mubr.f32.mxu1 %v826_v30 }
 0x13f   : > { %1517 = vmatpush3.msra.mxu1 %v786_v60  ;;  %1527 = vmatprep.mubr.f32.mxu0 %v2020_v28 }
 0x140   : > { %1518 = vmatprep.subr.mxu1 %v789_v63  ;;  %1528 = vmatmul.mubr.f32.vlgmr.msra.gmra.mxu0 %v2031_v38 }
 0x141   : > { %1519 = vmatpush3.msra.mxu1 %v789_v63 }
 0x142   : > { %1521 = vmatmul.mubr.f32.vlgmr.msra.gmra.mxu1 %v836_v50  ;;  %1530 = vmatprep.subr.mxu1 %v786_v60 }
 0x143   : > { %1531 = vmatpush3.msra.mxu1 %v786_v60  ;;  %1534 = vmatprep.mubr.f32.mxu1 %v2020_v28 }
 0x144   : > { %1532 = vmatprep.subr.mxu1 %v789_v63 }
 0x145   : > { %1533 = vmatpush3.msra.mxu1 %v789_v63 }
 0x146   : > { %1535 = vmatmul.mubr.f32.vlgmr.msra.gmra.mxu1 %v2031_v38 }
 0x1f5   : > { %v1501_v8 = vpop.f32.mrf.mxu0 }
 0x1f7   : > { %v830_v9 = vpop.f32.mrf.mxu0 }
 0x1fa   : > { %v1515_v10 = vpop.f32.mrf.mxu0 }
 0x1fc   : > { %v1003_v13 = vpop.f32.mrf.mxu0 }
 0x1fd   : > { %v1508_v11 = vpop.f32.mrf.mxu1 }
 0x1fe   : > { %v928_v12 = vadd.f32 %v1508_v11, %v1501_v8 }
 0x1ff   : > { %v921_v14 = vpop.f32.mrf.mxu1 }
 0x200   : > { %v1011_v15 = vadd.f32 %v1515_v10, %v928_v12  ;;  %v922_v16 = vadd.f32 %v921_v14, %v830_v9  ;;  %v1529_v19 = vpop.f32.mrf.mxu0 }
 0x202   : > { %v1004_v17 = vadd.f32 %v1003_v13, %v922_v16  ;;  %v1522_v18 = vpop.f32.mrf.mxu1  ;;  %v1170_v24 = vpop.f32.mrf.mxu0 }
 0x203   : > { %v1094_v20 = vadd.f32 %v1522_v18, %v1011_v15 }
 0x204   : > { %v1085_v21 = vpop.f32.mrf.mxu1 }
 0x205   : > { %v1177_v22 = vadd.f32 %v1529_v19, %v1094_v20  ;;  %v1086_v23 = vadd.f32 %v1085_v21, %v1004_v17 }
 0x206   : > { %v1536_v25 = vpop.f32.mrf.mxu1 }
 0x207   : > { %v1171_v26 = vadd.f32 %v1170_v24, %v1086_v23  ;;  %v1256_v27 = vadd.f32 %v1536_v25, %v1177_v22 }
 0x208   : > { %v1249_v28 = vpop.f32.mrf.mxu1 }
 0x209   : > { %1260 = vst.msk [vmem:[%s235_s7 + $0x8] sm:$0xff] %vm240_vm0, %v1256_v27  ;;  %v1250_v29 = vadd.f32 %v1249_v28, %v1171_v26 }
 0x20b   : > { %1259 = vst.msk [vmem:[%s235_s7] sm:$0xff] %vm240_vm0, %v1250_v29 }
 0x20c   : > { %1735 = shalt.err (!%p1732_p12)
}
 0x20d   : > { %s1736_s10 = scalar_lea.hbm %s2051_s23, 256  ;;  %s1740_s21 = scalar_lea.hbm %s2109_s3, 1536 }
 0x20e   : > { %p1737_p13 = scmp.ne.s32.totalorder %s2051_s23, %s1736_s10  ;;  %p1741_p5 = scmp.lt.s32.totalorder %s2051_s23, %s2109_s3 }
 0x20f   : > { %p1742_p7 = scmp.lt.s32.totalorder %s1740_s21, %s1736_s10 }
 0x210   : > { %p1738_p3 = pnand %p1737_p13, %p1969_p0 }
 0x211   : > { %p1743_p1 = por %p1742_p7, %p1741_p5 }
 0x212   : > { %p1739_p10 = pneg %p1738_p3 }
 0x214   : > { %p1744_p4 = pnand %p1743_p1, %p1739_p10 }
 0x216   : > { %1747 = shalt.err (!%p1744_p4)
}
 0x217   : > { %s1830_s22 = smov 128   ;;  %s1831_s24 = smov 8  }
 0x218   : > { %1549 = dma.vmem_to_hbm [thread:$0]  (%p1969_p0), %s2046_s11, 256, %s2051_s23, %s1262_s29, %s1830_s22, %s1830_s22, %s1831_s24  }
 0x219 PF: > { %s2133_s26 = sld [smem:[#allocation12_spill]]  ;;  %p1571_p8 = scmp.ge.s32.totalorder %s1822_s19, 2 }
 0x21b   : > { %p1563_p9 = pnand %p1571_p8, %p1911_p6 }
 0x21d   : > { %p1564_p2 = pneg %p1563_p9 }
 0x21f   : > { %s1292_s20 = sand.u32 1, %s2133_s26  }
 0x220   : > { %s1293_s15 = scalar_lea.sflag [#allocation4], %s1292_s20 }
 0x221   : > { %1789 = dma.done.wait (%p1564_p2), %s1293_s15, 256  }
 0x222   : > { %1791 = vsyncadd (%p1564_p2), %s1293_s15, 4294967040  ;;  %s20_s19 = sadd.s32 1, %s1822_s19   ;;  %s2135_s4 = sld [smem:[#allocation14_spill]] }
 0x223   : > { %p17_p11 = scmp.ge.s32.totalorder %s20_s19, 8   ;;  %s2136_s12 = smov %s1798_s13 }
 0x224   : > { %s2137_s13 = smov %s1802_s14  ;;  %s2138_s14 = smov %s1988_s1 }
 0x225   : > { %s2139_s15 = smov %s1814_s17  ;;  %s2140_s16 = smov %s1818_s18 }
 0x226   : > { %s2142_s18 = smov %s2148_s27  ;;  %19 = sbr.rel (!%p17_p11) target bundleno = 11 (0xb), region = 85 }
 0x228   : > { %s2141_s17 = smov %s2135_s4 }
 0x22b   :  { %1298 = vsyncpa [#allocation3], 1 }
 0x22c   :  { %1300 = vsyncpa [#allocation3 + $0x1], 1 }
 0x22d   :  { %1301 = vsyncpa [#allocation6], 1 }
 0x22e   :  { %1302 = vsyncpa [#allocation4], 1 }
 0x22f   :  { %1304 = vsyncpa [#allocation4 + $0x1], 1 }

</bundles_post_ra>
